<compile_context>
chip_gen: v7x
topology: tpu7x:2x2x1
jax: 0.10.0
libtpu: 0.0.40
codegen_flags: <defaults>
</compile_context>

<pallas_src>
import functools

import jax
import jax.numpy as jnp
from jax.experimental import pallas as pl
from jax.experimental.pallas import tpu as pltpu

LANE = 128
SUBLANE = 8
HIDDEN = 256


def _round_up(n, m):
    return ((n + m - 1) // m) * m


def _pad2(a, rows, cols):
    pr = rows - a.shape[0]
    pc = cols - a.shape[1]
    if pr == 0 and pc == 0:
        return a
    return jnp.pad(a, ((0, pr), (0, pc)))


def _vae_kernel(x_ref, w1_ref, b1_ref, w2m_ref, b2m_ref, w2l_ref, b2l_ref,
                eps_ref, w3_ref, b3_ref, w4_ref, b4_ref,
                recon_ref, mu_ref, logvar_ref):
    """Fused VAE forward on one batch tile.

    enc:     h1 = relu(x @ W1 + b1); mu / logvar via two lane-dense matmuls
    reparam: z  = mu + exp(0.5 * clamp(logvar, -10, 10)) * eps
    dec:     recon = relu(z @ W3 + b3) @ W4 + b4
    bf16 MXU inputs, f32 accumulation, f32 element-wise math.
    """
    x = x_ref[...].astype(jnp.bfloat16)

    # ----- encoder -----
    h1 = jnp.dot(x, w1_ref[...], preferred_element_type=jnp.float32) + b1_ref[...]
    h1 = jnp.maximum(h1, 0.0).astype(jnp.bfloat16)

    mu = jnp.dot(h1, w2m_ref[...], preferred_element_type=jnp.float32) + b2m_ref[...]
    logvar = jnp.dot(h1, w2l_ref[...], preferred_element_type=jnp.float32) + b2l_ref[...]

    # ----- reparameterization (clamp only affects sampling, logvar returned raw) -----
    logvar_c = jnp.clip(logvar, -10.0, 10.0)
    std = jnp.exp(0.5 * logvar_c)
    z = (mu + std * eps_ref[...]).astype(jnp.bfloat16)

    # ----- decoder -----
    h2 = jnp.dot(z, w3_ref[...], preferred_element_type=jnp.float32) + b3_ref[...]
    h2 = jnp.maximum(h2, 0.0).astype(jnp.bfloat16)
    recon = jnp.dot(h2, w4_ref[...], preferred_element_type=jnp.float32) + b4_ref[...]

    recon_ref[...] = recon
    mu_ref[...] = mu
    logvar_ref[...] = logvar


@functools.partial(jax.jit, static_argnames=("latent_dim",))
def vae_forward(x, params, eps, *, latent_dim):
    """params: dict of pre-transposed [in, out] weights (bf16) + f32 biases."""
    batch, input_dim = x.shape
    in_pad = _round_up(input_dim, LANE)
    lat_pad = _round_up(latent_dim, LANE)

    # Batch tile: small batches run as a single grid step (no wasted rows);
    # large batches are tiled 256 rows at a time with weights resident in VMEM.
    block_batch = min(256, _round_up(batch, SUBLANE))
    b_pad = _round_up(batch, block_batch)

    # Zero-pad everything to lane-dense shapes (done once per shape at trace
    # time; zero rows/cols contribute nothing to any matmul).
    x_p = _pad2(x, b_pad, in_pad)
    eps_p = _pad2(eps, b_pad, lat_pad)
    w1 = _pad2(params["w1"], in_pad, HIDDEN)
    b1 = params["b1"]
    w2m = _pad2(params["w2_mu"], HIDDEN, lat_pad)
    b2m = _pad2(params["b2_mu"], 1, lat_pad)
    w2l = _pad2(params["w2_logvar"], HIDDEN, lat_pad)
    b2l = _pad2(params["b2_logvar"], 1, lat_pad)
    w3 = _pad2(params["w3"], lat_pad, HIDDEN)
    b3 = params["b3"]
    w4 = _pad2(params["w4"], HIDDEN, in_pad)
    b4 = _pad2(params["b4"], 1, in_pad)

    grid = (b_pad // block_batch,)

    def act_spec(cols):
        return pl.BlockSpec((block_batch, cols), lambda i: (i, 0))

    def res_spec(rows, cols):
        # Same block index every grid step -> DMA'd once, resident in VMEM.
        return pl.BlockSpec((rows, cols), lambda i: (0, 0))

    out_shapes = (
        jax.ShapeDtypeStruct((b_pad, in_pad), jnp.float32),    # reconstruction
        jax.ShapeDtypeStruct((b_pad, lat_pad), jnp.float32),   # mu
        jax.ShapeDtypeStruct((b_pad, lat_pad), jnp.float32),   # logvar (unclamped)
    )

    recon_p, mu_p, logvar_p = pl.pallas_call(
        _vae_kernel,
        out_shape=out_shapes,
        grid=grid,
        in_specs=[
            act_spec(in_pad),            # x
            res_spec(in_pad, HIDDEN),    # w1
            res_spec(1, HIDDEN),         # b1
            res_spec(HIDDEN, lat_pad),   # w2_mu
            res_spec(1, lat_pad),        # b2_mu
            res_spec(HIDDEN, lat_pad),   # w2_logvar
            res_spec(1, lat_pad),        # b2_logvar
            act_spec(lat_pad),           # eps
            res_spec(lat_pad, HIDDEN),   # w3
            res_spec(1, HIDDEN),         # b3
            res_spec(HIDDEN, in_pad),    # w4
            res_spec(1, in_pad),         # b4
        ],
        out_specs=(
            act_spec(in_pad),
            act_spec(lat_pad),
            act_spec(lat_pad),
        ),
        compiler_params=pltpu.CompilerParams(
            dimension_semantics=("parallel",),
        ),
    )(x_p, w1, b1, w2m, b2m, w2l, b2l, eps_p, w3, b3, w4, b4)

    return (recon_p[:batch, :input_dim],
            mu_p[:batch, :latent_dim],
            logvar_p[:batch, :latent_dim])


def _xavier_uniform(key, fan_in, fan_out, dtype=jnp.float32):
    # Matches torch.nn.init.xavier_uniform_ for a [out, in] weight; built
    # directly in the transposed [in, out] layout used by the kernel (the
    # bound is symmetric in fan_in / fan_out).
    bound = (6.0 / (fan_in + fan_out)) ** 0.5
    return jax.random.uniform(key, (fan_in, fan_out), dtype=dtype,
                              minval=-bound, maxval=bound)


def init_vae_params(key, input_dim, latent_dim=20, hidden=256):
    k1, k2, k3, k4 = jax.random.split(key, 4)
    # w2 is generated as the single Linear(256, 2*latent) layer (so the xavier
    # bound matches PyTorch), then split into mu/logvar halves at init time.
    w1 = _xavier_uniform(k1, input_dim, hidden)
    w2 = _xavier_uniform(k2, hidden, latent_dim * 2)
    w3 = _xavier_uniform(k3, latent_dim, hidden)
    w4 = _xavier_uniform(k4, hidden, input_dim)
    bf16 = lambda a: a.astype(jnp.bfloat16)
    return {
        "w1": bf16(w1),
        "b1": jnp.zeros((1, hidden), jnp.float32),
        "w2_mu": bf16(w2[:, :latent_dim]),
        "b2_mu": jnp.zeros((1, latent_dim), jnp.float32),
        "w2_logvar": bf16(w2[:, latent_dim:]),
        "b2_logvar": jnp.zeros((1, latent_dim), jnp.float32),
        "w3": bf16(w3),
        "b3": jnp.zeros((1, hidden), jnp.float32),
        "w4": bf16(w4),
        "b4": jnp.zeros((1, input_dim), jnp.float32),
    }


def vae_reference(x, params, eps):
    """Pure-JAX reference performing the same bf16/f32 math as the kernel."""
    f32 = jnp.float32
    h1 = jnp.dot(x.astype(jnp.bfloat16), params["w1"],
                 preferred_element_type=f32) + params["b1"]
    h1 = jnp.maximum(h1, 0.0).astype(jnp.bfloat16)
    mu = jnp.dot(h1, params["w2_mu"], preferred_element_type=f32) + params["b2_mu"]
    logvar = jnp.dot(h1, params["w2_logvar"], preferred_element_type=f32) + params["b2_logvar"]
    std = jnp.exp(0.5 * jnp.clip(logvar, -10.0, 10.0))
    z = (mu + std * eps).astype(jnp.bfloat16)
    h2 = jnp.dot(z, params["w3"], preferred_element_type=f32) + params["b3"]
    h2 = jnp.maximum(h2, 0.0).astype(jnp.bfloat16)
    recon = jnp.dot(h2, params["w4"], preferred_element_type=f32) + params["b4"]
    return recon, mu, logvar


if __name__ == "__main__":
    key = jax.random.PRNGKey(0)
    k_param, k_x, k_eps = jax.random.split(key, 3)

    batch = 8
    input_dim = 32
    latent_dim = 20

    params = init_vae_params(k_param, input_dim, latent_dim)
    x = jax.random.normal(k_x, (batch, input_dim), dtype=jnp.float32)
    # torch.randn_like(std) equivalent: standard-normal noise generated outside
    # the kernel so the forward is a pure function of (x, params, eps).
    # TODO(synk): optionally generate eps in-kernel with pltpu.prng_seed /
    # pltpu.stateful_normal to drop one HBM input.
    eps = jax.random.normal(k_eps, (batch, latent_dim), dtype=jnp.float32)

    recon, mu, logvar = vae_forward(x, params, eps, latent_dim=latent_dim)
    jax.block_until_ready((recon, mu, logvar))

    r_ref, mu_ref, lv_ref = vae_reference(x, params, eps)
    assert recon.shape == (batch, input_dim)
    assert mu.shape == (batch, latent_dim)
    assert logvar.shape == (batch, latent_dim)
    assert jnp.allclose(recon, r_ref, atol=2e-2, rtol=2e-2)
    assert jnp.allclose(mu, mu_ref, atol=2e-2, rtol=2e-2)
    assert jnp.allclose(logvar, lv_ref, atol=2e-2, rtol=2e-2)

    print("KERNEL_OK")
</pallas_src>

<mosaic_0001>
module attributes {stable_mosaic.version = 11 : i64} {
  func.func @_vae_kernel(%arg0: i32, %arg1: memref<8x128xf32, #tpu.memory_space<vmem>>, %arg2: memref<128x256xbf16, #tpu.memory_space<vmem>>, %arg3: memref<1x256xf32, #tpu.memory_space<vmem>>, %arg4: memref<256x128xbf16, #tpu.memory_space<vmem>>, %arg5: memref<1x128xf32, #tpu.memory_space<vmem>>, %arg6: memref<256x128xbf16, #tpu.memory_space<vmem>>, %arg7: memref<1x128xf32, #tpu.memory_space<vmem>>, %arg8: memref<8x128xf32, #tpu.memory_space<vmem>>, %arg9: memref<128x256xbf16, #tpu.memory_space<vmem>>, %arg10: memref<1x256xf32, #tpu.memory_space<vmem>>, %arg11: memref<256x128xbf16, #tpu.memory_space<vmem>>, %arg12: memref<1x128xf32, #tpu.memory_space<vmem>>, %arg13: memref<8x128xf32, #tpu.memory_space<vmem>>, %arg14: memref<8x128xf32, #tpu.memory_space<vmem>>, %arg15: memref<8x128xf32, #tpu.memory_space<vmem>>) attributes {dimension_semantics = [#tpu.dimension_semantics<parallel>], iteration_bounds = array<i64: 1>, scalar_prefetch = 0 : i64, scratch_operands = 0 : i64, tpu.core_type = #tpu.core_type<tc>, window_params = [{transform_indices = @transform_0, window_bounds = array<i64: 8, 128>}, {pipeline_mode = #tpu.pipeline_mode<synchronous>, transform_indices = @transform_1, window_bounds = array<i64: 128, 256>}, {pipeline_mode = #tpu.pipeline_mode<synchronous>, transform_indices = @transform_2, window_bounds = array<i64: 1, 256>}, {pipeline_mode = #tpu.pipeline_mode<synchronous>, transform_indices = @transform_3, window_bounds = array<i64: 256, 128>}, {pipeline_mode = #tpu.pipeline_mode<synchronous>, transform_indices = @transform_4, window_bounds = array<i64: 1, 128>}, {pipeline_mode = #tpu.pipeline_mode<synchronous>, transform_indices = @transform_5, window_bounds = array<i64: 256, 128>}, {pipeline_mode = #tpu.pipeline_mode<synchronous>, transform_indices = @transform_6, window_bounds = array<i64: 1, 128>}, {transform_indices = @transform_7, window_bounds = array<i64: 8, 128>}, {pipeline_mode = #tpu.pipeline_mode<synchronous>, transform_indices = @transform_8, window_bounds = array<i64: 128, 256>}, {pipeline_mode = #tpu.pipeline_mode<synchronous>, transform_indices = @transform_9, window_bounds = array<i64: 1, 256>}, {pipeline_mode = #tpu.pipeline_mode<synchronous>, transform_indices = @transform_10, window_bounds = array<i64: 256, 128>}, {pipeline_mode = #tpu.pipeline_mode<synchronous>, transform_indices = @transform_11, window_bounds = array<i64: 1, 128>}, {transform_indices = @transform_12, window_bounds = array<i64: 8, 128>}, {transform_indices = @transform_13, window_bounds = array<i64: 8, 128>}, {transform_indices = @transform_14, window_bounds = array<i64: 8, 128>}]} {
    %c0 = arith.constant 0 : index
    %c0_0 = arith.constant 0 : index
    %0 = vector.load %arg1[%c0, %c0_0] : memref<8x128xf32, #tpu.memory_space<vmem>>, vector<8x128xf32>
    %1 = arith.truncf %0 : vector<8x128xf32> to vector<8x128xbf16>
    %c0_1 = arith.constant 0 : index
    %c0_2 = arith.constant 0 : index
    %2 = vector.load %arg2[%c0_1, %c0_2] : memref<128x256xbf16, #tpu.memory_space<vmem>>, vector<128x256xbf16>
    %cst = arith.constant dense<0.000000e+00> : vector<8x256xf32>
    %3 = tpu.matmul %1, %2, %cst {dimension_numbers = #tpu.dot_dimension_numbers<[1], [0], [0], [1], [0, 0, 1, 1], [], []>} : vector<8x128xbf16>, vector<128x256xbf16>, vector<8x256xf32> -> vector<8x256xf32>
    %c0_3 = arith.constant 0 : index
    %c0_4 = arith.constant 0 : index
    %4 = vector.load %arg3[%c0_3, %c0_4] : memref<1x256xf32, #tpu.memory_space<vmem>>, vector<1x256xf32>
    %5 = vector.broadcast %4 : vector<1x256xf32> to vector<8x256xf32>
    %6 = arith.addf %3, %5 : vector<8x256xf32>
    %cst_5 = arith.constant 0.000000e+00 : f32
    %7 = vector.broadcast %cst_5 : f32 to vector<8x256xf32>
    %8 = arith.maximumf %6, %7 : vector<8x256xf32>
    %9 = arith.truncf %8 : vector<8x256xf32> to vector<8x256xbf16>
    %c0_6 = arith.constant 0 : index
    %c0_7 = arith.constant 0 : index
    %10 = vector.load %arg4[%c0_6, %c0_7] : memref<256x128xbf16, #tpu.memory_space<vmem>>, vector<256x128xbf16>
    %cst_8 = arith.constant dense<0.000000e+00> : vector<8x128xf32>
    %11 = tpu.matmul %9, %10, %cst_8 {dimension_numbers = #tpu.dot_dimension_numbers<[1], [0], [0], [1], [0, 0, 1, 1], [], []>} : vector<8x256xbf16>, vector<256x128xbf16>, vector<8x128xf32> -> vector<8x128xf32>
    %c0_9 = arith.constant 0 : index
    %c0_10 = arith.constant 0 : index
    %12 = vector.load %arg5[%c0_9, %c0_10] : memref<1x128xf32, #tpu.memory_space<vmem>>, vector<1x128xf32>
    %13 = vector.broadcast %12 : vector<1x128xf32> to vector<8x128xf32>
    %14 = arith.addf %11, %13 : vector<8x128xf32>
    %c0_11 = arith.constant 0 : index
    %c0_12 = arith.constant 0 : index
    %15 = vector.load %arg6[%c0_11, %c0_12] : memref<256x128xbf16, #tpu.memory_space<vmem>>, vector<256x128xbf16>
    %cst_13 = arith.constant dense<0.000000e+00> : vector<8x128xf32>
    %16 = tpu.matmul %9, %15, %cst_13 {dimension_numbers = #tpu.dot_dimension_numbers<[1], [0], [0], [1], [0, 0, 1, 1], [], []>} : vector<8x256xbf16>, vector<256x128xbf16>, vector<8x128xf32> -> vector<8x128xf32>
    %c0_14 = arith.constant 0 : index
    %c0_15 = arith.constant 0 : index
    %17 = vector.load %arg7[%c0_14, %c0_15] : memref<1x128xf32, #tpu.memory_space<vmem>>, vector<1x128xf32>
    %18 = vector.broadcast %17 : vector<1x128xf32> to vector<8x128xf32>
    %19 = arith.addf %16, %18 : vector<8x128xf32>
    %cst_16 = arith.constant -1.000000e+01 : f32
    %cst_17 = arith.constant 1.000000e+01 : f32
    %20 = vector.broadcast %cst_16 : f32 to vector<8x128xf32>
    %21 = arith.maximumf %20, %19 : vector<8x128xf32>
    %22 = vector.broadcast %cst_17 : f32 to vector<8x128xf32>
    %23 = arith.minimumf %22, %21 : vector<8x128xf32>
    %cst_18 = arith.constant 5.000000e-01 : f32
    %24 = vector.broadcast %cst_18 : f32 to vector<8x128xf32>
    %25 = arith.mulf %24, %23 : vector<8x128xf32>
    %26 = math.exp %25 : vector<8x128xf32>
    %c0_19 = arith.constant 0 : index
    %c0_20 = arith.constant 0 : index
    %27 = vector.load %arg8[%c0_19, %c0_20] : memref<8x128xf32, #tpu.memory_space<vmem>>, vector<8x128xf32>
    %28 = arith.mulf %26, %27 : vector<8x128xf32>
    %29 = arith.addf %14, %28 : vector<8x128xf32>
    %30 = arith.truncf %29 : vector<8x128xf32> to vector<8x128xbf16>
    %c0_21 = arith.constant 0 : index
    %c0_22 = arith.constant 0 : index
    %31 = vector.load %arg9[%c0_21, %c0_22] : memref<128x256xbf16, #tpu.memory_space<vmem>>, vector<128x256xbf16>
    %cst_23 = arith.constant dense<0.000000e+00> : vector<8x256xf32>
    %32 = tpu.matmul %30, %31, %cst_23 {dimension_numbers = #tpu.dot_dimension_numbers<[1], [0], [0], [1], [0, 0, 1, 1], [], []>} : vector<8x128xbf16>, vector<128x256xbf16>, vector<8x256xf32> -> vector<8x256xf32>
    %c0_24 = arith.constant 0 : index
    %c0_25 = arith.constant 0 : index
    %33 = vector.load %arg10[%c0_24, %c0_25] : memref<1x256xf32, #tpu.memory_space<vmem>>, vector<1x256xf32>
    %34 = vector.broadcast %33 : vector<1x256xf32> to vector<8x256xf32>
    %35 = arith.addf %32, %34 : vector<8x256xf32>
    %cst_26 = arith.constant 0.000000e+00 : f32
    %36 = vector.broadcast %cst_26 : f32 to vector<8x256xf32>
    %37 = arith.maximumf %35, %36 : vector<8x256xf32>
    %38 = arith.truncf %37 : vector<8x256xf32> to vector<8x256xbf16>
    %c0_27 = arith.constant 0 : index
    %c0_28 = arith.constant 0 : index
    %39 = vector.load %arg11[%c0_27, %c0_28] : memref<256x128xbf16, #tpu.memory_space<vmem>>, vector<256x128xbf16>
    %cst_29 = arith.constant dense<0.000000e+00> : vector<8x128xf32>
    %40 = tpu.matmul %38, %39, %cst_29 {dimension_numbers = #tpu.dot_dimension_numbers<[1], [0], [0], [1], [0, 0, 1, 1], [], []>} : vector<8x256xbf16>, vector<256x128xbf16>, vector<8x128xf32> -> vector<8x128xf32>
    %c0_30 = arith.constant 0 : index
    %c0_31 = arith.constant 0 : index
    %41 = vector.load %arg12[%c0_30, %c0_31] : memref<1x128xf32, #tpu.memory_space<vmem>>, vector<1x128xf32>
    %42 = vector.broadcast %41 : vector<1x128xf32> to vector<8x128xf32>
    %43 = arith.addf %40, %42 : vector<8x128xf32>
    %c0_32 = arith.constant 0 : index
    %c0_33 = arith.constant 0 : index
    %44 = vector.load %arg13[%c0_32, %c0_33] : memref<8x128xf32, #tpu.memory_space<vmem>>, vector<8x128xf32>
    tpu.vector_store %arg13[%c0_32, %c0_33], %43 {strides = array<i32>} : memref<8x128xf32, #tpu.memory_space<vmem>>, vector<8x128xf32>,
    %c0_34 = arith.constant 0 : index
    %c0_35 = arith.constant 0 : index
    %45 = vector.load %arg14[%c0_34, %c0_35] : memref<8x128xf32, #tpu.memory_space<vmem>>, vector<8x128xf32>
    tpu.vector_store %arg14[%c0_34, %c0_35], %14 {strides = array<i32>} : memref<8x128xf32, #tpu.memory_space<vmem>>, vector<8x128xf32>,
    %c0_36 = arith.constant 0 : index
    %c0_37 = arith.constant 0 : index
    %46 = vector.load %arg15[%c0_36, %c0_37] : memref<8x128xf32, #tpu.memory_space<vmem>>, vector<8x128xf32>
    tpu.vector_store %arg15[%c0_36, %c0_37], %19 {strides = array<i32>} : memref<8x128xf32, #tpu.memory_space<vmem>>, vector<8x128xf32>,
    return
  }
  func.func @transform_0(%arg0: i32) -> (i32, i32) {
    %c0_i32 = arith.constant 0 : i32
    %c0_i32_0 = arith.constant 0 : i32
    return %arg0, %c0_i32 : i32, i32
  }
  func.func @transform_1(%arg0: i32) -> (i32, i32) {
    %c0_i32 = arith.constant 0 : i32
    %c0_i32_0 = arith.constant 0 : i32
    %c0_i32_1 = arith.constant 0 : i32
    return %c0_i32, %c0_i32_0 : i32, i32
  }
  func.func @transform_2(%arg0: i32) -> (i32, i32) {
    %c0_i32 = arith.constant 0 : i32
    %c0_i32_0 = arith.constant 0 : i32
    %c0_i32_1 = arith.constant 0 : i32
    return %c0_i32, %c0_i32_0 : i32, i32
  }
  func.func @transform_3(%arg0: i32) -> (i32, i32) {
    %c0_i32 = arith.constant 0 : i32
    %c0_i32_0 = arith.constant 0 : i32
    %c0_i32_1 = arith.constant 0 : i32
    return %c0_i32, %c0_i32_0 : i32, i32
  }
  func.func @transform_4(%arg0: i32) -> (i32, i32) {
    %c0_i32 = arith.constant 0 : i32
    %c0_i32_0 = arith.constant 0 : i32
    %c0_i32_1 = arith.constant 0 : i32
    return %c0_i32, %c0_i32_0 : i32, i32
  }
  func.func @transform_5(%arg0: i32) -> (i32, i32) {
    %c0_i32 = arith.constant 0 : i32
    %c0_i32_0 = arith.constant 0 : i32
    %c0_i32_1 = arith.constant 0 : i32
    return %c0_i32, %c0_i32_0 : i32, i32
  }
  func.func @transform_6(%arg0: i32) -> (i32, i32) {
    %c0_i32 = arith.constant 0 : i32
    %c0_i32_0 = arith.constant 0 : i32
    %c0_i32_1 = arith.constant 0 : i32
    return %c0_i32, %c0_i32_0 : i32, i32
  }
  func.func @transform_7(%arg0: i32) -> (i32, i32) {
    %c0_i32 = arith.constant 0 : i32
    %c0_i32_0 = arith.constant 0 : i32
    return %arg0, %c0_i32 : i32, i32
  }
  func.func @transform_8(%arg0: i32) -> (i32, i32) {
    %c0_i32 = arith.constant 0 : i32
    %c0_i32_0 = arith.constant 0 : i32
    %c0_i32_1 = arith.constant 0 : i32
    return %c0_i32, %c0_i32_0 : i32, i32
  }
  func.func @transform_9(%arg0: i32) -> (i32, i32) {
    %c0_i32 = arith.constant 0 : i32
    %c0_i32_0 = arith.constant 0 : i32
    %c0_i32_1 = arith.constant 0 : i32
    return %c0_i32, %c0_i32_0 : i32, i32
  }
  func.func @transform_10(%arg0: i32) -> (i32, i32) {
    %c0_i32 = arith.constant 0 : i32
    %c0_i32_0 = arith.constant 0 : i32
    %c0_i32_1 = arith.constant 0 : i32
    return %c0_i32, %c0_i32_0 : i32, i32
  }
  func.func @transform_11(%arg0: i32) -> (i32, i32) {
    %c0_i32 = arith.constant 0 : i32
    %c0_i32_0 = arith.constant 0 : i32
    %c0_i32_1 = arith.constant 0 : i32
    return %c0_i32, %c0_i32_0 : i32, i32
  }
  func.func @transform_12(%arg0: i32) -> (i32, i32) {
    %c0_i32 = arith.constant 0 : i32
    %c0_i32_0 = arith.constant 0 : i32
    return %arg0, %c0_i32 : i32, i32
  }
  func.func @transform_13(%arg0: i32) -> (i32, i32) {
    %c0_i32 = arith.constant 0 : i32
    %c0_i32_0 = arith.constant 0 : i32
    return %arg0, %c0_i32 : i32, i32
  }
  func.func @transform_14(%arg0: i32) -> (i32, i32) {
    %c0_i32 = arith.constant 0 : i32
    %c0_i32_0 = arith.constant 0 : i32
    return %arg0, %c0_i32 : i32, i32
  }
}

</mosaic_0001>

<bundles_post_ra>
// kernel: vae_forward.1
= control target key start
LH: loop header
LB: loop body
LE: loop exit
PB: predicated region body
PF: predicated region fallthrough
CT: control target
= control target key end

     0   :  { %20 = vsyncpa [#allocation3], 0  ;;  %v1255_v2 = vmov 0   ;;  %s1645_s0 = inlined_call_operand.vmem [shape: f32[8,128], index: 0, kind: input, shape index: {}]   ;;  %s1646_s1 = inlined_call_operand.vmem [shape: bf16[128,256], index: 1, kind: input, shape index: {}]   ;;  %s1647_s2 = inlined_call_operand.vmem [shape: f32[1,256], index: 2, kind: input, shape index: {}]   ;;  %s1648_s3 = inlined_call_operand.vmem [shape: bf16[256,128], index: 3, kind: input, shape index: {}]   ;;  %s1649_s4 = inlined_call_operand.vmem [shape: f32[1,128], index: 4, kind: input, shape index: {}]   ;;  %s1650_s5 = inlined_call_operand.vmem [shape: bf16[256,128], index: 5, kind: input, shape index: {}]   ;;  %s1651_s6 = inlined_call_operand.vmem [shape: f32[1,128], index: 6, kind: input, shape index: {}]   ;;  %s1652_s7 = inlined_call_operand.vmem [shape: f32[8,128], index: 7, kind: input, shape index: {}]   ;;  %s1653_s8 = inlined_call_operand.vmem [shape: bf16[128,256], index: 8, kind: input, shape index: {}]   ;;  %s1654_s9 = inlined_call_operand.vmem [shape: f32[1,256], index: 9, kind: input, shape index: {}]   ;;  %s1655_s10 = inlined_call_operand.vmem [shape: bf16[256,128], index: 10, kind: input, shape index: {}]   ;;  %s1656_s11 = inlined_call_operand.vmem [shape: f32[1,128], index: 11, kind: input, shape index: {}]   ;;  %s1657_s12 = inlined_call_operand.hbm [shape: f32[8,128], index: 12, kind: output, shape index: {0}]   ;;  %s1658_s13 = inlined_call_operand.hbm [shape: f32[8,128], index: 13, kind: output, shape index: {1}]   ;;  %s1659_s14 = inlined_call_operand.hbm [shape: f32[8,128], index: 14, kind: output, shape index: {2}]  }
   0x1   :  { %v1087_v0 = vld [vmem:[%s1646_s1 + $0x4] ss:$8 sps:$4 sm:$0xff]   ;;  %v1089_v1 = vld [vmem:[%s1646_s1] ss:$8 sps:$4 sm:$0xff]   ;;  %189 = vmatprep.mubr.bf16.mxu0 %v1255_v2  ;;  %v1090_v3 = vld [vmem:[%s1646_s1 + $0x14] ss:$8 sps:$4 sm:$0xff]  }
   0x2   :  { %157 = vmatprep.subr.bf16.mxu0 %v1087_v0  ;;  %v1092_v4 = vld [vmem:[%s1646_s1 + $0x10] ss:$8 sps:$4 sm:$0xff]   ;;  %v1093_v5 = vld [vmem:[%s1646_s1 + $0x24] ss:$8 sps:$4 sm:$0xff]   ;;  %v1095_v6 = vld [vmem:[%s1646_s1 + $0x20] ss:$8 sps:$4 sm:$0xff]  }
   0x3   :  { %158 = vmatpush1.bf16.msra.mxu0 %v1089_v1  ;;  %v1096_v7 = vld [vmem:[%s1646_s1 + $0x34] ss:$8 sps:$4 sm:$0xff]   ;;  %v1098_v8 = vld [vmem:[%s1646_s1 + $0x30] ss:$8 sps:$4 sm:$0xff]   ;;  %v1111_v9 = vld [vmem:[%s1648_s3 + $0x40] sm:$0xff]  }
   0x4   :  { %159 = vmatprep.subr.bf16.mxu0 %v1090_v3  ;;  %v1099_v10 = vld [vmem:[%s1646_s1 + $0x44] ss:$8 sps:$4 sm:$0xff]   ;;  %1017 = vmatprep.subr.bf16.mxu1 %v1111_v9  ;;  %v1101_v12 = vld [vmem:[%s1646_s1 + $0x40] ss:$8 sps:$4 sm:$0xff]   ;;  %v1102_v14 = vld [vmem:[%s1646_s1 + $0x54] ss:$8 sps:$4 sm:$0xff]  }
   0x5   :  { %v1113_v11 = vld [vmem:[%s1648_s3] sm:$0xff]   ;;  %v1115_v13 = vld [vmem:[%s1648_s3 + $0x48] sm:$0xff]   ;;  %v1104_v16 = vld [vmem:[%s1646_s1 + $0x50] ss:$8 sps:$4 sm:$0xff]  }
   0x6   :  { %1018 = vmatpush3.bf16.msra.mxu1 %v1113_v11  ;;  %v1117_v15 = vld [vmem:[%s1648_s3 + $0x8] sm:$0xff]   ;;  %v1119_v17 = vld [vmem:[%s1648_s3 + $0x50] sm:$0xff]   ;;  %v1123_v21 = vld [vmem:[%s1648_s3 + $0x58] sm:$0xff]  }
   0x7   :  { %160 = vmatpush1.bf16.msra.mxu0 %v1092_v4  ;;  %1019 = vmatprep.subr.bf16.mxu1 %v1115_v13  ;;  %v1105_v18 = vld [vmem:[%s1646_s1 + $0x64] ss:$8 sps:$4 sm:$0xff]   ;;  %v1121_v19 = vld [vmem:[%s1648_s3 + $0x10] sm:$0xff]   ;;  %v1107_v20 = vld [vmem:[%s1646_s1 + $0x60] ss:$8 sps:$4 sm:$0xff]  }
   0x8   :  { %161 = vmatprep.subr.bf16.mxu0 %v1093_v5  ;;  %v1108_v22 = vld [vmem:[%s1646_s1 + $0x74] ss:$8 sps:$4 sm:$0xff]   ;;  %v1110_v23 = vld [vmem:[%s1646_s1 + $0x70] ss:$8 sps:$4 sm:$0xff]   ;;  %v47_v25 = vld [vmem:[%s1645_s0] sm:$0xff] }
   0x9   :  { %v1125_v24 = vld [vmem:[%s1648_s3 + $0x18] sm:$0xff]   ;;  %v1127_v26 = vld [vmem:[%s1648_s3 + $0x60] sm:$0xff]   ;;  %v48_v29 = vpack.c.bf16 %v47_v25, %v47_v25  ;;  %v1131_v31 = vld [vmem:[%s1648_s3 + $0x68] sm:$0xff]  }
   0xa   :  { %1020 = vmatpush3.bf16.msra.mxu1 %v1117_v15  ;;  %v1112_v27 = vld [vmem:[%s1650_s5 + $0x40] sm:$0xff]   ;;  %v1116_v32 = vld [vmem:[%s1650_s5 + $0x48] sm:$0xff]   ;;  %v1120_v35 = vld [vmem:[%s1650_s5 + $0x50] sm:$0xff]  }
   0xb   :  { %162 = vmatpush1.bf16.msra.mxu0 %v1095_v6  ;;  %1021 = vmatprep.subr.bf16.mxu1 %v1119_v17  ;;  %v1129_v28 = vld [vmem:[%s1648_s3 + $0x20] sm:$0xff]   ;;  %v1133_v33 = vld [vmem:[%s1648_s3 + $0x28] sm:$0xff]   ;;  %v1122_v36 = vld [vmem:[%s1650_s5 + $0x10] sm:$0xff]  }
   0xc   :  { %163 = vmatprep.subr.bf16.mxu0 %v1096_v7  ;;  %v1114_v30 = vld [vmem:[%s1650_s5] sm:$0xff]   ;;  %v1118_v34 = vld [vmem:[%s1650_s5 + $0x8] sm:$0xff]   ;;  %v1124_v37 = vld [vmem:[%s1650_s5 + $0x58] sm:$0xff]  }
   0xd   :  { %v1126_v38 = vld [vmem:[%s1650_s5 + $0x18] sm:$0xff]   ;;  %v1128_v39 = vld [vmem:[%s1650_s5 + $0x60] sm:$0xff]   ;;  %v1132_v41 = vld [vmem:[%s1650_s5 + $0x68] sm:$0xff]  }
   0xe   :  { %1022 = vmatpush3.bf16.msra.mxu1 %v1121_v19  ;;  %v1130_v40 = vld [vmem:[%s1650_s5 + $0x20] sm:$0xff]   ;;  %v1134_v42 = vld [vmem:[%s1650_s5 + $0x28] sm:$0xff]  }
   0xf   :  { %164 = vmatpush1.bf16.msra.mxu0 %v1098_v8  ;;  %1023 = vmatprep.subr.bf16.mxu1 %v1123_v21 }
  0x10   :  { %165 = vmatprep.subr.bf16.mxu0 %v1099_v10 }
  0x12   :  { %1024 = vmatpush3.bf16.msra.mxu1 %v1125_v24 }
  0x13   :  { %166 = vmatpush1.bf16.msra.mxu0 %v1101_v12  ;;  %1025 = vmatprep.subr.bf16.mxu1 %v1127_v26 }
  0x14   :  { %167 = vmatprep.subr.bf16.mxu0 %v1102_v14 }
  0x16   :  { %1026 = vmatpush3.bf16.msra.mxu1 %v1129_v28 }
  0x17   :  { %168 = vmatpush1.bf16.msra.mxu0 %v1104_v16  ;;  %1027 = vmatprep.subr.bf16.mxu1 %v1131_v31 }
  0x18   :  { %169 = vmatprep.subr.bf16.mxu0 %v1105_v18 }
  0x1a   :  { %1028 = vmatpush3.bf16.msra.mxu1 %v1133_v33 }
  0x1b   :  { %170 = vmatpush1.bf16.msra.mxu0 %v1107_v20 }
  0x1c   :  { %171 = vmatprep.subr.bf16.mxu0 %v1108_v22 }
  0x1f   :  { %172 = vmatpush1.bf16.msra.mxu0 %v1110_v23 }
  0x20   :  { %1039 = vmatprep.subr.bf16.mxu0 %v1112_v27 }
  0x22   :  { %190 = vmatmul.mubr.bf16.vlgmr.msra.gmra.mrb[0].mxu0 %v48_v29 }
  0x23   :  { %1040 = vmatpush3.bf16.msra.mxu0 %v1114_v30 }
  0x24   :  { %1041 = vmatprep.subr.bf16.mxu0 %v1116_v32 }
  0x27   :  { %1042 = vmatpush3.bf16.msra.mxu0 %v1118_v34 }
  0x28   :  { %1043 = vmatprep.subr.bf16.mxu0 %v1120_v35 }
  0x2b   :  { %1044 = vmatpush3.bf16.msra.mxu0 %v1122_v36 }
  0x2c   :  { %1045 = vmatprep.subr.bf16.mxu0 %v1124_v37 }
  0x2f   :  { %1046 = vmatpush3.bf16.msra.mxu0 %v1126_v38 }
  0x30   :  { %1047 = vmatprep.subr.bf16.mxu0 %v1128_v39 }
  0x33   :  { %1048 = vmatpush3.bf16.msra.mxu0 %v1130_v40 }
  0x34   :  { %1049 = vmatprep.subr.bf16.mxu0 %v1132_v41 }
  0x37   :  { %1050 = vmatpush3.bf16.msra.mxu0 %v1134_v42 }
  0x38   :  { %21 = vsyncpa [#allocation5], 0  ;;  %v1135_v43 = vld [vmem:[%s1648_s3 + $0x70] sm:$0xff]   ;;  %v1139_v47 = vld [vmem:[%s1648_s3 + $0x78] sm:$0xff]   ;;  %v67_v52 = vlaneseq }
  0x39   :  { %v1136_v44 = vld [vmem:[%s1650_s5 + $0x70] sm:$0xff]   ;;  %1029 = vmatprep.subr.bf16.mxu1 %v1135_v43  ;;  %v1140_v48 = vld [vmem:[%s1650_s5 + $0x78] sm:$0xff]   ;;  %v1145_v51 = vld [vmem:[%s1653_s8 + $0x4] ss:$8 sps:$4 sm:$0xff]  }
  0x3a   :  { %v1137_v45 = vld [vmem:[%s1648_s3 + $0x30] sm:$0xff]   ;;  %1051 = vmatprep.subr.bf16.mxu0 %v1136_v44  ;;  %v1141_v49 = vld [vmem:[%s1648_s3 + $0x38] sm:$0xff]   ;;  %v1485_v53 = vshrl.u32 %v67_v52, 7  ;;  %v65_v55 = vld [vmem:[%s1647_s2] sm:$0x3] }
  0x3b   :  { %v1138_v46 = vld [vmem:[%s1650_s5 + $0x30] sm:$0xff]   ;;  %1030 = vmatpush3.bf16.msra.mxu1 %v1137_v45  ;;  %v1142_v50 = vld [vmem:[%s1650_s5 + $0x38] sm:$0xff]   ;;  %v1143_v5 = vld [vmem:[%s1653_s8] ss:$8 sps:$4 sm:$0xff]  }
  0x3c   :  { %1052 = vmatpush3.bf16.msra.mxu0 %v1138_v46  ;;  %1031 = vmatprep.subr.bf16.mxu1 %v1139_v47  ;;  %v69_v54 = vsub.s32 0, %v1485_v53  ;;  %v73_v56 = vsub.s32 1, %v1485_v53  ;;  %v1148_v7 = vld [vmem:[%s1653_s8 + $0x14] ss:$8 sps:$4 sm:$0xff]   ;;  %v1146_v8 = vld [vmem:[%s1653_s8 + $0x10] ss:$8 sps:$4 sm:$0xff]  }
  0x3d   :  { %1053 = vmatprep.subr.bf16.mxu0 %v1140_v48  ;;  %v1151_v9 = vld [vmem:[%s1653_s8 + $0x24] ss:$8 sps:$4 sm:$0xff]   ;;  %v1149_v10 = vld [vmem:[%s1653_s8 + $0x20] ss:$8 sps:$4 sm:$0xff]   ;;  %v1152_v11 = vld [vmem:[%s1653_s8 + $0x30] ss:$8 sps:$4 sm:$0xff]  }
  0x3e   :  { %v70_v57 = vrot.slane %v65_v55, %v69_v54  ;;  %v74_v58 = vrot.slane %v65_v55, %v73_v56  ;;  %v1157_v12 = vld [vmem:[%s1653_s8 + $0x44] ss:$8 sps:$4 sm:$0xff]   ;;  %v1155_v13 = vld [vmem:[%s1653_s8 + $0x40] ss:$8 sps:$4 sm:$0xff]   ;;  %v1160_v14 = vld [vmem:[%s1653_s8 + $0x54] ss:$8 sps:$4 sm:$0xff]  }
  0x3f   :  { %1032 = vmatpush3.bf16.msra.mxu1 %v1141_v49  ;;  %v1158_v15 = vld [vmem:[%s1653_s8 + $0x50] ss:$8 sps:$4 sm:$0xff]   ;;  %v1163_v16 = vld [vmem:[%s1653_s8 + $0x64] ss:$8 sps:$4 sm:$0xff]   ;;  %v1161_v17 = vld [vmem:[%s1653_s8 + $0x60] ss:$8 sps:$4 sm:$0xff]  }
  0x40   :  { %1054 = vmatpush3.bf16.msra.mxu0 %v1142_v50  ;;  %669 = vmatprep.subr.bf16.mxu1 %v1145_v51  ;;  %v1166_v18 = vld [vmem:[%s1653_s8 + $0x74] ss:$8 sps:$4 sm:$0xff]   ;;  %v1164_v19 = vld [vmem:[%s1653_s8 + $0x70] ss:$8 sps:$4 sm:$0xff]   ;;  %v1167_v20 = vld [vmem:[%s1655_s10 + $0x40] sm:$0xff]  }
  0x41   :  { %v1168_v21 = vld [vmem:[%s1655_s10] sm:$0xff]   ;;  %v1169_v22 = vld [vmem:[%s1655_s10 + $0x48] sm:$0xff]   ;;  %1061 = vmatprep.subr.bf16.mxu0 %v1167_v20  ;;  %v1171_v24 = vld [vmem:[%s1655_s10 + $0x50] sm:$0xff]  }
  0x42   :  { %v1170_v23 = vld [vmem:[%s1655_s10 + $0x8] sm:$0xff]   ;;  %v1172_v25 = vld [vmem:[%s1655_s10 + $0x10] sm:$0xff]   ;;  %v1173_v26 = vld [vmem:[%s1655_s10 + $0x58] sm:$0xff]  }
  0x43   :  { %v1174_v27 = vld [vmem:[%s1655_s10 + $0x18] sm:$0xff]   ;;  %v1175_v28 = vld [vmem:[%s1655_s10 + $0x60] sm:$0xff]   ;;  %v1177_v30 = vld [vmem:[%s1655_s10 + $0x68] sm:$0xff]  }
  0x44   :  { %v1176_v29 = vld [vmem:[%s1655_s10 + $0x20] sm:$0xff]   ;;  %v1178_v31 = vld [vmem:[%s1655_s10 + $0x28] sm:$0xff]  }
  0x45   :  { %v949_v34 = vld [vmem:[%s1649_s4] ss:$0 sm:$0xff] }
  0x46   :  { %v966_v36 = vld [vmem:[%s1651_s6] ss:$0 sm:$0xff] }
  0x47   :  { %v557_v49 = vld [vmem:[%s1652_s7] sm:$0xff] }
  0xf5   :  { %v191_v59 = vpop.f32.mrb[0].mxu0 }
  0xf6   :  { %v192_v60 = vadd.f32 %v191_v59, %v70_v57  ;;  %v193_v61 = vpop.f32.mrb[1].mxu0  ;;  %v1179_v57 = vld [vmem:[%s1655_s10 + $0x70] sm:$0xff]   ;;  %v1181_v59 = vld [vmem:[%s1655_s10 + $0x78] sm:$0xff]  }
  0xf7   :  { %v194_v62 = vadd.f32 %v193_v61, %v74_v58  ;;  %v195_v63 = vpop.f32.mrb[2].mxu0  ;;  %v1180_v58 = vld [vmem:[%s1655_s10 + $0x30] sm:$0xff]   ;;  %v577_v61 = vld [vmem:[%s1654_s9] sm:$0x3] }
  0xf8   :  { %v198_v0 = vmax.f32 %v192_v60, 0.0  ;;  %v196_v1 = vpop.f32.mrb[3].mxu0  ;;  %v1182_v60 = vld [vmem:[%s1655_s10 + $0x38] sm:$0xff]   ;;  %v586_v63 = vrot.slane %v577_v61, %v73_v56  ;;  %s1256_s10 = smov [#allocation4]  }
  0xf9   :  { %v199_v3 = vmax.f32 %v194_v62, 0.0  ;;  %v582_v62 = vrot.slane %v577_v61, %v69_v54  ;;  %s908_s9 = sshll.u32 %s1256_s10, 4  ;;  %s909_s9 = int_to_ptr.vmem [resolvable:$true] %s908_s9 }
  0xfa   :  { %v200_v6 = vpack.c.bf16 %v198_v0, %v198_v0  ;;  %s1185_s2 = scalar_lea.vmem %s909_s9, 128  ;;  %p1190_p1 = scmp.lt.s32.totalorder %s909_s9, %s909_s9 }
  0xfb   :  { %v201_v4 = vpack.c.bf16 %v199_v3, %v199_v3  ;;  %p1186_p0 = scmp.ne.s32.totalorder %s909_s9, %s1185_s2  ;;  %p1191_p2 = scmp.lt.s32.totalorder %s1185_s2, %s1185_s2 }
  0xfd   :  { %369 = vmatprep.mubr.bf16.mxu1 %v201_v4  ;;  %544 = vmatprep.mubr.bf16.mxu0 %v201_v4  ;;  %p1192_p3 = por %p1191_p2, %p1190_p1 }
  0xfe   :  { %370 = vmatmul.mubr.bf16.vlgmr.msra.gmra.mrb[0].mxu1 %v200_v6  ;;  %545 = vmatmul.mubr.bf16.vlgmr.msra.gmra.mrb[4].mxu0 %v200_v6 }
  0xff   :  { %670 = vmatpush1.bf16.msra.mxu1 %v1143_v5  ;;  %701 = vmatprep.mubr.bf16.mxu1 %v1255_v2  ;;  %v1154_v2 = vld [vmem:[%s1653_s8 + $0x34] ss:$8 sps:$4 sm:$0xff]   ;;  %p1193_p4 = pnand %p1192_p3, %p1186_p0 }
 0x100   :  { %671 = vmatprep.subr.bf16.mxu1 %v1148_v7  ;;  %1062 = vmatpush3.bf16.msra.mxu0 %v1168_v21 }
 0x101   :  { %1063 = vmatprep.subr.bf16.mxu0 %v1169_v22 }
 0x103   :  { %672 = vmatpush1.bf16.msra.mxu1 %v1146_v8 }
 0x104   :  { %673 = vmatprep.subr.bf16.mxu1 %v1151_v9  ;;  %1064 = vmatpush3.bf16.msra.mxu0 %v1170_v23 }
 0x105   :  { %1065 = vmatprep.subr.bf16.mxu0 %v1171_v24 }
 0x107   :  { %674 = vmatpush1.bf16.msra.mxu1 %v1149_v10 }
 0x108   :  { %675 = vmatprep.subr.bf16.mxu1 %v1154_v2  ;;  %1066 = vmatpush3.bf16.msra.mxu0 %v1172_v25 }
 0x109   :  { %1067 = vmatprep.subr.bf16.mxu0 %v1173_v26 }
 0x10b   :  { %676 = vmatpush1.bf16.msra.mxu1 %v1152_v11 }
 0x10c   :  { %677 = vmatprep.subr.bf16.mxu1 %v1157_v12  ;;  %1068 = vmatpush3.bf16.msra.mxu0 %v1174_v27 }
 0x10d   :  { %1069 = vmatprep.subr.bf16.mxu0 %v1175_v28 }
 0x10f   :  { %678 = vmatpush1.bf16.msra.mxu1 %v1155_v13 }
 0x110   :  { %679 = vmatprep.subr.bf16.mxu1 %v1160_v14  ;;  %1070 = vmatpush3.bf16.msra.mxu0 %v1176_v29 }
 0x111   :  { %1071 = vmatprep.subr.bf16.mxu0 %v1177_v30 }
 0x113   :  { %680 = vmatpush1.bf16.msra.mxu1 %v1158_v15 }
 0x114   :  { %681 = vmatprep.subr.bf16.mxu1 %v1163_v16  ;;  %1072 = vmatpush3.bf16.msra.mxu0 %v1178_v31 }
 0x115   :  { %1073 = vmatprep.subr.bf16.mxu0 %v1179_v57 }
 0x117   :  { %682 = vmatpush1.bf16.msra.mxu1 %v1161_v17 }
 0x118   :  { %683 = vmatprep.subr.bf16.mxu1 %v1166_v18  ;;  %1074 = vmatpush3.bf16.msra.mxu0 %v1180_v58 }
 0x119   :  { %1075 = vmatprep.subr.bf16.mxu0 %v1181_v59 }
 0x11b   :  { %684 = vmatpush1.bf16.msra.mxu1 %v1164_v19 }
 0x11c   :  { %1076 = vmatpush3.bf16.msra.mxu0 %v1182_v60 }
 0x1d1   :  { %v1033_v32 = vpop.f32.mrb[0].mxu1  ;;  %v1055_v33 = vpop.f32.mrb[4].mxu0 }
 0x1d2   :  { %v1034_v35 = vpop.f32.mrb[1].mxu1  ;;  %v1056_v37 = vpop.f32.mrb[5].mxu0 }
 0x1d3   :  { %v1035_v38 = vadd.f32 %v1034_v35, %v1033_v32  ;;  %v1057_v39 = vadd.f32 %v1056_v37, %v1055_v33  ;;  %v1036_v40 = vpop.f32.mrb[2].mxu1  ;;  %v1058_v41 = vpop.f32.mrb[6].mxu0 }
 0x1d4   :  { %v1037_v42 = vpop.f32.mrb[3].mxu1  ;;  %v1059_v43 = vpop.f32.mrb[7].mxu0 }
 0x1d5   :  { %v372_v44 = vadd.f32 %v1035_v38, %v949_v34  ;;  %v547_v45 = vadd.f32 %v1057_v39, %v966_v36 }
 0x1d7   :  { %890 = vst [vmem:[#allocation4] sm:$0xff] %v372_v44  ;;  %v983_v46 = vclamps-f32 %v547_v45, 10.0  ;;  %891 = vst [vmem:[#allocation6] sm:$0xff] %v547_v45 }
 0x1d9   :  { %v554_v47 = vmul.f32 0.5, %v983_v46 }
 0x1db   :  { %v555_v48 = vmul.f32 1.442695, %v554_v47 }
 0x1dd   :  { %1183 = vpow2.f32 %v555_v48 }
 0x1e7   :  { %v1184_v50 = vpop.eup %1183 }
 0x1e8   :  { %v558_v51 = vmul.f32 %v1184_v50, %v557_v49 }
 0x1ea   :  { %v559_v52 = vadd.f32 %v558_v51, %v372_v44 }
 0x1ec   :  { %v560_v55 = vpack.c.bf16 %v559_v52, %v559_v52 }
 0x1ee   :  { %702 = vmatmul.mubr.bf16.vlgmr.msra.gmra.mrb[4].mxu1 %v560_v55 }
 0x2c1   :  { %v703_v0 = vpop.f32.mrb[4].mxu1 }
 0x2c2   :  { %v704_v1 = vadd.f32 %v703_v0, %v582_v62  ;;  %v705_v3 = vpop.f32.mrb[5].mxu1 }
 0x2c3   :  { %v706_v4 = vadd.f32 %v705_v3, %v586_v63  ;;  %v707_v5 = vpop.f32.mrb[6].mxu1 }
 0x2c4   :  { %v710_v6 = vmax.f32 %v704_v1, 0.0  ;;  %v708_v7 = vpop.f32.mrb[7].mxu1 }
 0x2c5   :  { %v711_v8 = vmax.f32 %v706_v4, 0.0 }
 0x2c6   :  { %v712_v10 = vpack.c.bf16 %v710_v6, %v710_v6 }
 0x2c7   :  { %v713_v9 = vpack.c.bf16 %v711_v8, %v711_v8 }
 0x2c9   :  { %881 = vmatprep.mubr.bf16.mxu0 %v713_v9 }
 0x2ca   :  { %882 = vmatmul.mubr.bf16.vlgmr.msra.gmra.mrb[8].mxu0 %v712_v10 }
 0x2cb   :  { %1196 = shalt.err (!%p1193_p4)
}
 0x2cc   :  { %s1197_s15 = scalar_lea.hbm %s1658_s13, 128 }
 0x2cd   :  { %p1198_p5 = scmp.ne.s32.totalorder %s1658_s13, %s1197_s15  ;;  %p1201_p6 = scmp.lt.u32.totalorder %s1197_s15, %s1658_s13 }
 0x2cf   :  { %p1203_p7 = pnand %p1201_p6, %p1198_p5 }
 0x2d1   :  { %1206 = shalt.err (!%p1203_p7)
}
 0x2d2   :  { %911 = dma.vmem_to_hbm [thread:$0]  %s909_s9, 128, %s1658_s13, [#allocation5]  }
 0x2d3   :  { %s1257_s21 = smov [#allocation6]  }
 0x2d4   :  { %s918_s0 = sshll.u32 %s1257_s21, 4  ;;  %s919_s0 = int_to_ptr.vmem [resolvable:$true] %s918_s0 }
 0x2d5   :  { %s1207_s22 = scalar_lea.vmem %s919_s0, 128  ;;  %p1212_p9 = scmp.lt.s32.totalorder %s919_s0, %s919_s0 }
 0x2d6   :  { %p1208_p8 = scmp.ne.s32.totalorder %s919_s0, %s1207_s22  ;;  %p1213_p10 = scmp.lt.s32.totalorder %s1207_s22, %s1207_s22 }
 0x2d8   :  { %p1214_p11 = por %p1213_p10, %p1212_p9 }
 0x2da   :  { %p1215_p12 = pnand %p1214_p11, %p1208_p8 }
 0x2dc   :  { %1218 = shalt.err (!%p1215_p12)
}
 0x2dd   :  { %s1219_s6 = scalar_lea.hbm %s1659_s14, 128 }
 0x2de   :  { %p1220_p13 = scmp.ne.s32.totalorder %s1659_s14, %s1219_s6  ;;  %p1223_p0 = scmp.lt.u32.totalorder %s1219_s6, %s1659_s14 }
 0x2e0   :  { %p1225_p1 = pnand %p1223_p0, %p1220_p13 }
 0x2e2   :  { %1228 = shalt.err (!%p1225_p1)
}
 0x2e3   :  { %921 = dma.vmem_to_hbm [thread:$0]  %s919_s0, 128, %s1659_s14, [#allocation5]   ;;  %v1000_v56 = vld [vmem:[%s1656_s11] ss:$0 sm:$0xff] }
 0x2e4   :  { %s1258_s5 = smov [#allocation2]  }
 0x2e5   :  { %s898_s28 = sshll.u32 %s1258_s5, 4  ;;  %s899_s28 = int_to_ptr.vmem [resolvable:$true] %s898_s28 }
 0x2e6   :  { %s1229_s10 = scalar_lea.vmem %s899_s28, 128  ;;  %p1234_p3 = scmp.lt.s32.totalorder %s899_s28, %s899_s28 }
 0x2e7   :  { %p1230_p2 = scmp.ne.s32.totalorder %s899_s28, %s1229_s10  ;;  %p1235_p4 = scmp.lt.s32.totalorder %s1229_s10, %s1229_s10 }
 0x2e9   :  { %p1236_p5 = por %p1235_p4, %p1234_p3 }
 0x2eb   :  { %p1237_p6 = pnand %p1236_p5, %p1230_p2 }
 0x39d   :  { %v1077_v53 = vpop.f32.mrb[8].mxu0 }
 0x39e   :  { %v1078_v54 = vpop.f32.mrb[9].mxu0 }
 0x39f   :  { %v1079_v2 = vadd.f32 %v1078_v54, %v1077_v53  ;;  %v1080_v11 = vpop.f32.mrb[10].mxu0 }
 0x3a0   :  { %v1081_v12 = vpop.f32.mrb[11].mxu0 }
 0x3a1   :  { %v884_v13 = vadd.f32 %v1079_v2, %v1000_v56 }
 0x3a3   :  { %889 = vst [vmem:[#allocation2] sm:$0xff] %v884_v13 }
 0x3a4   :  { %1240 = shalt.err (!%p1237_p6)
}
 0x3a5   :  { %s1241_s2 = scalar_lea.hbm %s1657_s12, 128 }
 0x3a6   :  { %p1242_p7 = scmp.ne.s32.totalorder %s1657_s12, %s1241_s2  ;;  %p1245_p8 = scmp.lt.u32.totalorder %s1241_s2, %s1657_s12 }
 0x3a8   :  { %p1247_p9 = pnand %p1245_p8, %p1242_p7 }
 0x3aa   :  { %1250 = shalt.err (!%p1247_p9)
}
 0x3ab   :  { %901 = dma.vmem_to_hbm [thread:$0]  %s899_s28, 128, %s1657_s12, [#allocation3]  }
 0x3ac   :  { %1251 = dma.done.wait [#allocation3], 128  }
 0x3ad   :  { %1252 = vsyncadd [#allocation3], 4294967168 }
 0x3ae   :  { %1253 = dma.done.wait [#allocation5], 256  }
 0x3af   :  { %1254 = vsyncadd [#allocation5], 4294967040 }
 0x3b0   :  { %931 = vsyncpa [#allocation3], 1 }
 0x3b1   :  { %932 = vsyncpa [#allocation5], 1 }

</bundles_post_ra>
